<compile_context>
chip_gen: v5e
topology: v5e:2x2
jax: 0.10.0
libtpu: 0.0.40
codegen_flags: <defaults>
</compile_context>

<pallas_src>
import jax
import jax.numpy as jnp
from jax.experimental import pallas as pl
from jax.experimental.pallas import tpu as pltpu

_LANES = 128
_SUBLANES = 8
# Per-buffer VMEM budget for one grid step: output (row_tile, hw) tile plus the
# input tile, which is physically lane-padded to (row_tile, 128) in VMEM.
# Double-buffered this is ~24 MiB -> fits comfortably under the 48 MiB scoped
# limit we request and under v7x's 64 MiB physical VMEM.
_MAX_BLOCK_BYTES = 12 << 20
# Above this total-output size we require >= 2 grid steps so v7x's second
# TensorCore gets work (harmless on single-TC v5e/v6e).
_MIN_TWO_STEP_BYTES = 4 << 20
_VMEM_LIMIT_BYTES = 48 << 20


def _scalar_to_grid_kernel(x_ref, out_ref):
    # x_ref: (row_tile, 1) column of scalars resident in VMEM.
    # out_ref: (row_tile, H*W) lane-dense output block.
    # Pure VPU lane-broadcast; the HBM write DMA is the binding resource.
    out_ref[...] = jnp.broadcast_to(x_ref[...], out_ref.shape)


def _pick_row_tile(padded_rows, hw, dtype_size, total_out_bytes):
    """Largest multiple-of-8 divisor of padded_rows whose per-buffer VMEM
    footprint fits the budget (optionally forcing >= 2 grid steps).

    Returns None if even the minimal 8-row block does not fit (huge hw);
    the caller falls back to a plain XLA broadcast in that case.
    """

    def block_bytes(rt):
        # Output block (rt, hw) + input block lane-padded to (rt, 128).
        return rt * (hw + _LANES) * dtype_size

    if block_bytes(_SUBLANES) > _MAX_BLOCK_BYTES:
        return None

    min_steps = 2 if (total_out_bytes >= _MIN_TWO_STEP_BYTES
                      and padded_rows >= 2 * _SUBLANES) else 1

    # Candidate tiles = multiple-of-8 divisors of padded_rows, i.e. 8*d for
    # every divisor d of padded_rows // 8. Enumerate and take the largest that
    # fits the budget and the min-step requirement.
    m = padded_rows // _SUBLANES
    divisors = set()
    d = 1
    while d * d <= m:
        if m % d == 0:
            divisors.add(d)
            divisors.add(m // d)
        d += 1

    best = _SUBLANES  # always valid (checked above)
    for d in sorted(divisors, reverse=True):
        rt = _SUBLANES * d
        if padded_rows // rt < min_steps:
            continue
        if block_bytes(rt) <= _MAX_BLOCK_BYTES:
            best = rt
            break
    return best


def scalar_to_grid_block(x, image_dim, *, min_pallas_bytes=1 << 20):
    """Pallas equivalent of Scalar_to_Grid_Block.forward.

    Args:
      x: (B, num_scalars) array.
      image_dim: spatial size of the output grid.
      min_pallas_bytes: outputs smaller than this go through a plain
        jnp.broadcast_to (launch overhead would dominate a Pallas call).
    Returns:
      (B, num_scalars, image_dim, image_dim) array where every (H, W) plane
      is filled with the corresponding scalar.
    """
    B, C = x.shape
    rows = B * C
    hw = image_dim * image_dim
    dtype_size = jnp.dtype(x.dtype).itemsize
    out_shape = (B, C, image_dim, image_dim)
    total_out_bytes = rows * hw * dtype_size

    # Tiny outputs: let XLA fuse the broadcast; avoids the fixed pallas_call
    # launch overhead and an extra HBM round trip.
    if total_out_bytes < min_pallas_bytes:
        return jnp.broadcast_to(x.reshape(B, C, 1, 1), out_shape)

    # Pad rows up to a multiple of 8 so the pipeline always tiles cleanly.
    padded_rows = -(-rows // _SUBLANES) * _SUBLANES
    x_col = x.reshape(rows, 1)
    if padded_rows != rows:
        x_col = jnp.pad(x_col, ((0, padded_rows - rows), (0, 0)))

    row_tile = _pick_row_tile(padded_rows, hw, dtype_size, total_out_bytes)
    if row_tile is None:
        # Even an 8-row block overflows the VMEM budget (enormous hw);
        # fall back to the plain XLA broadcast rather than risk OOM.
        return jnp.broadcast_to(x.reshape(B, C, 1, 1), out_shape)

    # TODO(synk): when hw % 128 != 0, pack k rows per output row (k*hw % 128 == 0)
    # for fully lane-dense stores on awkward image_dims; hw = image_dim^2 is
    # already a multiple of 128 for the common even image_dims (16, 32, ...).

    grid = (padded_rows // row_tile,)

    out_flat = pl.pallas_call(
        _scalar_to_grid_kernel,
        out_shape=jax.ShapeDtypeStruct((padded_rows, hw), x.dtype),
        grid=grid,
        in_specs=[pl.BlockSpec((row_tile, 1), lambda i: (i, 0))],
        out_specs=pl.BlockSpec((row_tile, hw), lambda i: (i, 0)),
        compiler_params=pltpu.CompilerParams(
            dimension_semantics=("parallel",),
            vmem_limit_bytes=_VMEM_LIMIT_BYTES),
        cost_estimate=pl.CostEstimate(
            flops=0,
            transcendentals=0,
            bytes_accessed=padded_rows * hw * dtype_size
            + padded_rows * dtype_size),
    )(x_col)

    if padded_rows != rows:
        out_flat = out_flat[:rows]
    return out_flat.reshape(out_shape)


if __name__ == "__main__":
    # Module params (deterministic, synthetic): batch=2, num_scalars=4, image_dim=16
    batch_size = 2
    num_scalars = 4
    image_dim = 16

    key = jax.random.PRNGKey(0)
    x = jax.random.normal(key, (batch_size, num_scalars), dtype=jnp.float32)

    ref = jnp.broadcast_to(
        x.reshape(batch_size, num_scalars, 1, 1),
        (batch_size, num_scalars, image_dim, image_dim),
    )

    # 1) Default path: tiny 8 KiB output -> short-circuits to XLA broadcast.
    out = jax.block_until_ready(scalar_to_grid_block(x, image_dim))
    assert out.shape == ref.shape
    assert out.dtype == x.dtype
    assert jnp.array_equal(out, ref)

    # 2) Force the Pallas kernel path so it is exercised on TPU.
    out_k = jax.block_until_ready(
        scalar_to_grid_block(x, image_dim, min_pallas_bytes=0))
    assert out_k.shape == ref.shape
    assert out_k.dtype == x.dtype
    assert jnp.array_equal(out_k, ref)

    # 3) Unaligned row count (3*5 = 15 rows, padded to 16) through the Pallas path.
    x2 = jax.random.normal(jax.random.PRNGKey(0), (3, 5), dtype=jnp.float32)
    ref2 = jnp.broadcast_to(x2.reshape(3, 5, 1, 1), (3, 5, image_dim, image_dim))
    out2 = jax.block_until_ready(
        scalar_to_grid_block(x2, image_dim, min_pallas_bytes=0))
    assert jnp.array_equal(out2, ref2)

    print("KERNEL_OK")
</pallas_src>

<mosaic_0001>
module attributes {stable_mosaic.version = 11 : i64} {
  func.func @_scalar_to_grid_kernel(%arg0: i32, %arg1: memref<8x1xf32, #tpu.memory_space<vmem>>, %arg2: memref<8x256xf32, #tpu.memory_space<vmem>>) attributes {dimension_semantics = [#tpu.dimension_semantics<parallel>], iteration_bounds = array<i64: 1>, scalar_prefetch = 0 : i64, scratch_operands = 0 : i64, tpu.core_type = #tpu.core_type<tc>, window_params = [{transform_indices = @transform_0, window_bounds = array<i64: 8, 1>}, {transform_indices = @transform_1, window_bounds = array<i64: 8, 256>}]} {
    %c0 = arith.constant 0 : index
    %c0_0 = arith.constant 0 : index
    %0 = vector.load %arg1[%c0, %c0_0] : memref<8x1xf32, #tpu.memory_space<vmem>>, vector<8x1xf32>
    %1 = vector.shape_cast %0 : vector<8x1xf32> to vector<8x1xf32>
    %2 = vector.broadcast %1 : vector<8x1xf32> to vector<8x256xf32>
    %c0_1 = arith.constant 0 : index
    %c0_2 = arith.constant 0 : index
    %3 = vector.load %arg2[%c0_1, %c0_2] : memref<8x256xf32, #tpu.memory_space<vmem>>, vector<8x256xf32>
    tpu.vector_store %arg2[%c0_1, %c0_2], %2 {strides = array<i32>} : memref<8x256xf32, #tpu.memory_space<vmem>>, vector<8x256xf32>,
    return
  }
  func.func @transform_0(%arg0: i32) -> (i32, i32) {
    %c0_i32 = arith.constant 0 : i32
    %c0_i32_0 = arith.constant 0 : i32
    return %arg0, %c0_i32 : i32, i32
  }
  func.func @transform_1(%arg0: i32) -> (i32, i32) {
    %c0_i32 = arith.constant 0 : i32
    %c0_i32_0 = arith.constant 0 : i32
    return %arg0, %c0_i32 : i32, i32
  }
}

</mosaic_0001>

<bundles_post_ra>
// kernel: tpu_custom_call.1
= control target key start
LH: loop header
LB: loop body
LE: loop exit
PB: predicated region body
PF: predicated region fallthrough
CT: control target
= control target key end

     0   :  { %s80_s0 = inlined_call_operand.vmem [shape: f32[8,1], index: 0, kind: input, shape index: {}]   ;;  %s81_s1 = inlined_call_operand.hbm [shape: f32[8,256], index: 1, kind: output, shape index: {}]  }
   0x1   :  { %v9_v0 = vld [vmem:[%s80_s0] sm:$0xff] }
   0x2   :  { %6 = vsyncpa [#allocation3], 0  ;;  %v62_v1 = vmov 0   ;;  %s63_s8 = smov [#allocation2]   ;;  %s24_s12 = sshll.u32 %s81_s1, 4  ;;  %s25_s12 = int_to_ptr.hbm [resolvable:$true] %s24_s12 }
   0x3   :  { %35 = vset.pattern.permute.xlu0 %v62_v1  ;;  %s22_s9 = sshll.u32 %s63_s8, 4  ;;  %s23_s9 = int_to_ptr.vmem [resolvable:$true] %s22_s9 }
   0x4   :  { %12 = vperm.xlu0 %35, %v9_v0  }
  0x76   :  { %v13_v2 = vpop.permute.xlu0 %12 }
  0x77   :  { %15 = vst [vmem:[#allocation2] sm:$0xff] %v13_v2 }
  0x78   :  { %16 = vst [vmem:[#allocation2 + $0x8] sm:$0xff] %v13_v2 }
  0x79   :  { %27 = dma.vmem_to_hbm [thread:$0]  %s23_s9, 256, %s25_s12, [#allocation3]  }
  0x7a   :  { %60 = dma.done.wait [#allocation3], 256  }
  0x7b   :  { %61 = vsyncadd [#allocation3], 4294967040 }
  0x7c   :  { %32 = vsyncpa [#allocation3], 1 }

</bundles_post_ra>
